<compile_context>
chip_gen: v5e
topology: v5e:2x2
jax: 0.10.0
libtpu: 0.0.40
codegen_flags: <defaults>
</compile_context>

<pallas_src>
import functools

import jax
import jax.numpy as jnp
from jax.experimental import pallas as pl
from jax.experimental.pallas import tpu as pltpu


def _rup(x, m):
    return ((x + m - 1) // m) * m


# ---------------------------------------------------------------------------
# Kernel 1: tiled matmul with fused (folded-BN) affine + ReLU.
#   out = act((A @ W) * scale + shift); A/W bf16, accumulate f32.
# ---------------------------------------------------------------------------
def _matmul_affine_kernel(relu, a_ref, w_ref, s_ref, b_ref, o_ref, acc_ref):
    @pl.when(pl.program_id(2) == 0)
    def _():
        acc_ref[...] = jnp.zeros_like(acc_ref)

    acc_ref[...] += jnp.dot(a_ref[...], w_ref[...],
                            preferred_element_type=jnp.float32)

    @pl.when(pl.program_id(2) == pl.num_programs(2) - 1)
    def _():
        y = acc_ref[...] * s_ref[...] + b_ref[...]
        if relu:
            y = jnp.maximum(y, 0.0)
        o_ref[...] = y.astype(o_ref.dtype)


def matmul_affine(a, w, s, b, relu=True):
    """a:(M,K), w:(Kp,Np) pre-padded bf16, s/b:(1,Np) f32 -> (M,Np) bf16."""
    m, k = a.shape
    kp, np_ = w.shape
    tm = min(256, _rup(m, 16))                 # never inflate tiny M up to 128
    tn = 256 if np_ % 256 == 0 else 128        # MXU-shaped N tile
    tk = kp                                    # every K in this net fits one pass (<= 4608)
    mp = _rup(m, tm)
    a = a.astype(jnp.bfloat16)
    if (mp, kp) != (m, k):
        a = jnp.pad(a, ((0, mp - m), (0, kp - k)))
    out = pl.pallas_call(
        functools.partial(_matmul_affine_kernel, relu),
        out_shape=jax.ShapeDtypeStruct((mp, np_), jnp.bfloat16),
        grid_spec=pltpu.PrefetchScalarGridSpec(
            num_scalar_prefetch=0,
            grid=(mp // tm, np_ // tn, kp // tk),
            in_specs=[
                pl.BlockSpec((tm, tk), lambda i, j, kk: (i, kk)),
                pl.BlockSpec((tk, tn), lambda i, j, kk: (kk, j)),
                pl.BlockSpec((1, tn), lambda i, j, kk: (0, j)),
                pl.BlockSpec((1, tn), lambda i, j, kk: (0, j)),
            ],
            out_specs=pl.BlockSpec((tm, tn), lambda i, j, kk: (i, j)),
            scratch_shapes=[pltpu.VMEM((tm, tn), jnp.float32)],
        ),
        compiler_params=pltpu.CompilerParams(
            dimension_semantics=("parallel", "parallel", "arbitrary")),
    )(a, w, s, b)
    return out[:m] if mp != m else out


# ---------------------------------------------------------------------------
# Kernel 2: direct 3x3 / stride-1 / pad-1 convolution, fused BN affine + residual + ReLU.
# The padded image is flattened to ((H+2)*(W+2), C).  With output row index m laid out with the
# same W+2 stride, tap (di,dj) contributes x_flat[m + di*(W+2)+dj] @ W_tap, i.e. one contiguous
# sublane slice per tap -> no im2col duplication.  Junk columns are discarded by the wrapper.
# ---------------------------------------------------------------------------
def _conv3x3_kernel(h, w, c, mblk, relu, has_res, *refs):
    if has_res:
        x_ref, w_ref, s_ref, b_ref, r_ref, o_ref = refs
    else:
        x_ref, w_ref, s_ref, b_ref, o_ref = refs
        r_ref = None
    wp2 = w + 2
    mf = h * wp2
    cn = o_ref.shape[-1]
    offs = [di * wp2 + dj for di in range(3) for dj in range(3)]
    m0 = 0
    while m0 < mf:
        ml = min(mblk, mf - m0)
        acc = jnp.zeros((ml, cn), jnp.float32)
        for t, off in enumerate(offs):
            a = x_ref[0, off + m0:off + m0 + ml, :]
            acc = acc + jnp.dot(a, w_ref[t * c:(t + 1) * c, :],
                                preferred_element_type=jnp.float32)
        y = acc * s_ref[...] + b_ref[...]
        if has_res:
            y = y + r_ref[0, m0:m0 + ml, :].astype(jnp.float32)
        if relu:
            y = jnp.maximum(y, 0.0)
        o_ref[0, m0:m0 + ml, :] = y.astype(o_ref.dtype)
        m0 += mblk


def conv3x3_s1(x, wf, s, b, cout, relu=True, res=None):
    """x:(N,H,W,C) ; wf:(9*C,Coutp) bf16 ; s,b:(1,Coutp) f32 ; res:(N,H,W,cout) or None."""
    n, h, w, c = x.shape
    coutp = wf.shape[1]
    wp2 = w + 2
    lf = (h + 2) * wp2
    mf = h * wp2
    lfp = _rup(lf + 2, 8)          # room for the largest tap offset
    xf = jnp.pad(x.astype(jnp.bfloat16),
                 ((0, 0), (1, 1), (1, 1), (0, 0))).reshape(n, lf, c)
    xf = jnp.pad(xf, ((0, 0), (0, lfp - lf), (0, 0)))
    tn = 256 if coutp % 256 == 0 else 128
    ins = [xf, wf, s, b]
    in_specs = [
        pl.BlockSpec((1, lfp, c), lambda i, j: (i, 0, 0)),
        pl.BlockSpec((wf.shape[0], tn), lambda i, j: (0, j)),
        pl.BlockSpec((1, tn), lambda i, j: (0, j)),
        pl.BlockSpec((1, tn), lambda i, j: (0, j)),
    ]
    has_res = res is not None
    if has_res:
        cres = res.shape[-1]
        rf = jnp.pad(res.astype(jnp.bfloat16),
                     ((0, 0), (0, 0), (0, 2), (0, coutp - cres))).reshape(n, mf, coutp)
        ins.append(rf)
        in_specs.append(pl.BlockSpec((1, mf, tn), lambda i, j: (i, 0, j)))
    out = pl.pallas_call(
        functools.partial(_conv3x3_kernel, h, w, c, 256, relu, has_res),
        out_shape=jax.ShapeDtypeStruct((n, mf, coutp), jnp.bfloat16),
        grid_spec=pltpu.PrefetchScalarGridSpec(
            num_scalar_prefetch=0,
            grid=(n, coutp // tn),
            in_specs=in_specs,
            out_specs=pl.BlockSpec((1, mf, tn), lambda i, j: (i, 0, j)),
        ),
        compiler_params=pltpu.CompilerParams(
            dimension_semantics=("parallel", "parallel")),
    )(*ins)
    # drop the 2 junk columns per row and the channel padding
    return out.reshape(n, h, wp2, coutp)[:, :, :w, :cout]


# ---------------------------------------------------------------------------
# im2col wrapper (stride-2 3x3 convs, 1x1 convs) -> matmul_affine
# ---------------------------------------------------------------------------
def conv_im2col(x, wf, s, b, kh, kw, stride, padding, cout, relu=True):
    n, h, w, c = x.shape
    x = x.astype(jnp.bfloat16)
    if kh == 1 and kw == 1:
        xs = x[:, ::stride, ::stride, :] if stride > 1 else x
        ho, wo = xs.shape[1], xs.shape[2]
        a = xs.reshape(n * ho * wo, c)
    else:
        xp = jnp.pad(x, ((0, 0), (padding, padding), (padding, padding), (0, 0)))
        ho = (h + 2 * padding - kh) // stride + 1
        wo = (w + 2 * padding - kw) // stride + 1
        cols = [xp[:, i:i + (ho - 1) * stride + 1:stride,
                   j:j + (wo - 1) * stride + 1:stride, :]
                for i in range(kh) for j in range(kw)]
        a = jnp.concatenate(cols, axis=-1).reshape(n * ho * wo, kh * kw * c)
    out = matmul_affine(a, wf, s, b, relu=relu)
    return out[:, :cout].reshape(n, ho, wo, cout)


# ---------------------------------------------------------------------------
# ConvTranspose2d(k=3, s=2, p=1, op=1)+BN+ReLU via sub-pixel decomposition (4 phases).
# ---------------------------------------------------------------------------
def deconv3x3_s2_subpixel(x, phase_ws, s, b, cout, relu=True):
    n, h, w, c = x.shape
    x = x.astype(jnp.bfloat16)
    xp = jnp.pad(x, ((0, 0), (0, 1), (0, 1), (0, 0)))      # zero row/col at the far edge
    x00 = x                                                 # x[i,   j  ]
    xr = xp[:, 1:h + 1, :w, :]                              # x[i+1, j  ]
    xc = xp[:, :h, 1:w + 1, :]                              # x[i,   j+1]
    xrc = xp[:, 1:h + 1, 1:w + 1, :]                        # x[i+1, j+1]
    phases_in = [
        x00,                                                # (even,even): w[1,1]
        jnp.concatenate([xc, x00], axis=-1),                # (even,odd):  w[1,0], w[1,2]
        jnp.concatenate([xr, x00], axis=-1),                # (odd, even): w[0,1], w[2,1]
        jnp.concatenate([xrc, xr, xc, x00], axis=-1),       # (odd, odd):  w[0,0],w[0,2],w[2,0],w[2,2]
    ]
    outs = []
    for a, wf in zip(phases_in, phase_ws):
        m = n * h * w
        o = matmul_affine(a.reshape(m, a.shape[-1]), wf, s, b, relu=relu)
        outs.append(o[:, :cout].reshape(n, h, w, cout))
    p00, p01, p10, p11 = outs
    row0 = jnp.stack([p00, p01], axis=3).reshape(n, h, 2 * w, cout)
    row1 = jnp.stack([p10, p11], axis=3).reshape(n, h, 2 * w, cout)
    return jnp.stack([row0, row1], axis=2).reshape(n, 2 * h, 2 * w, cout)


# ---------------------------------------------------------------------------
# JAX glue: bilinear 2x upsample (align_corners=True) and Up's center pad/crop.
# ---------------------------------------------------------------------------
def upsample2x_bilinear(x):
    n, h, w, c = x.shape
    v = x.astype(jnp.float32)

    def interp(v, axis, insize):
        outsize = 2 * insize
        if insize == 1:
            return jnp.repeat(v, outsize, axis=axis)
        pos = jnp.arange(outsize, dtype=jnp.float32) * (insize - 1) / (outsize - 1)
        i0 = jnp.clip(jnp.floor(pos).astype(jnp.int32), 0, insize - 2)
        frac = pos - i0.astype(jnp.float32)
        lo = jnp.take(v, i0, axis=axis)
        hi = jnp.take(v, i0 + 1, axis=axis)
        shape = [1, 1, 1, 1]
        shape[axis] = outsize
        return lo * (1.0 - frac.reshape(shape)) + hi * frac.reshape(shape)

    v = interp(v, 1, h)
    v = interp(v, 2, w)
    return v.astype(jnp.bfloat16)


def center_pad_or_crop(x, th, tw):
    """Replicates F.pad(x, [dx//2, dx-dx//2, dy//2, dy-dy//2]); negative pad = crop."""
    n, h, w, c = x.shape
    dy, dx = th - h, tw - w
    top, bot = dy // 2, dy - dy // 2
    lef, rig = dx // 2, dx - dx // 2
    x = x[:, max(0, -top):h - max(0, -bot), max(0, -lef):w - max(0, -rig), :]
    pt, pb, pL, pR = max(0, top), max(0, bot), max(0, lef), max(0, rig)
    if pt or pb or pL or pR:
        x = jnp.pad(x, ((0, 0), (pt, pb), (pL, pR), (0, 0)))
    return x


# ---------------------------------------------------------------------------
# deterministic synthetic parameters (BN folded, weights flattened/padded once)
# ---------------------------------------------------------------------------
class ParamGen:
    def __init__(self, key):
        self.key = key
        self.i = 0

    def _next(self):
        self.i += 1
        return jax.random.fold_in(self.key, self.i)

    def conv_w(self, kh, kw, cin, cout):
        fan_in = kh * kw * cin
        return (jax.random.normal(self._next(), (kh, kw, cin, cout), jnp.float32)
                * (2.0 / fan_in) ** 0.5)

    def deconv_w(self, cin, cout, kh, kw):
        fan_in = kh * kw * cin
        return (jax.random.normal(self._next(), (cin, cout, kh, kw), jnp.float32)
                * (2.0 / fan_in) ** 0.5)

    def bn(self, c):
        eps = 1e-5
        gamma = 1.0 + 0.1 * jax.random.normal(self._next(), (c,), jnp.float32)
        beta = 0.1 * jax.random.normal(self._next(), (c,), jnp.float32)
        mean = 0.05 * jax.random.normal(self._next(), (c,), jnp.float32)
        var = jnp.abs(1.0 + 0.1 * jax.random.normal(self._next(), (c,), jnp.float32))
        scale = gamma / jnp.sqrt(var + eps)
        shift = beta - mean * scale
        return scale, shift


def _pad_nc(v, np_):
    return jnp.pad(v.astype(jnp.float32), (0, np_ - v.shape[0])).reshape(1, np_)


def make_conv_params(pg, kh, kw, cin, cout, stride=1, padding=1):
    w = pg.conv_w(kh, kw, cin, cout)
    scale, shift = pg.bn(cout)
    coutp = _rup(cout, 128)
    direct = (kh == 3 and kw == 3 and stride == 1 and padding == 1 and cin >= 16)
    wf = w.reshape(kh * kw * cin, cout)
    wf = jnp.pad(wf, ((0, 0), (0, coutp - cout)))
    if not direct:
        kp = _rup(kh * kw * cin, 128)
        wf = jnp.pad(wf, ((0, kp - kh * kw * cin), (0, 0)))
    return dict(kind='direct' if direct else 'im2col',
                wf=wf.astype(jnp.bfloat16),
                s=_pad_nc(scale, coutp), b=_pad_nc(shift, coutp),
                kh=kh, kw=kw, cin=cin, cout=cout, stride=stride, padding=padding)


def apply_conv(p, x, relu=True, res=None):
    if p['kind'] == 'direct':
        return conv3x3_s1(x, p['wf'], p['s'], p['b'], p['cout'], relu=relu, res=res)
    assert res is None
    return conv_im2col(x, p['wf'], p['s'], p['b'], p['kh'], p['kw'],
                       p['stride'], p['padding'], p['cout'], relu=relu)


def make_basic_block(pg, cin, planes, stride):
    blk = dict(conv1=make_conv_params(pg, 3, 3, cin, planes, stride=stride, padding=1),
               conv2=make_conv_params(pg, 3, 3, planes, planes, stride=1, padding=1))
    if stride != 1 or cin != planes:
        blk['down'] = make_conv_params(pg, 1, 1, cin, planes, stride=stride, padding=0)
    return blk


def apply_basic_block(blk, x):
    identity = apply_conv(blk['down'], x, relu=False) if 'down' in blk else x
    h1 = apply_conv(blk['conv1'], x, relu=True)
    # conv2: BN affine + residual add + ReLU fused in the kernel epilogue
    return apply_conv(blk['conv2'], h1, relu=True, res=identity)


def make_layer(pg, cin, planes, nblocks, stride):
    blocks = [make_basic_block(pg, cin, planes, stride)]
    for _ in range(nblocks - 1):
        blocks.append(make_basic_block(pg, planes, planes, 1))
    return blocks


def apply_layer(blocks, x):
    for blk in blocks:
        x = apply_basic_block(blk, x)
    return x


def make_double_conv(pg, cin, cout, cmid=None):
    cmid = cmid or cout
    return dict(c1=make_conv_params(pg, 3, 3, cin, cmid),
                c2=make_conv_params(pg, 3, 3, cmid, cout))


def make_up(pg, cin, cout):
    # Up(bilinear=True): DoubleConv(in, out, in // 2)
    return dict(conv=make_double_conv(pg, cin, cout, cin // 2))


def apply_up(up, x1, x2):
    x1 = upsample2x_bilinear(x1)
    x1 = center_pad_or_crop(x1, x2.shape[1], x2.shape[2])
    x = (x2.astype(jnp.float32) + x1.astype(jnp.float32)).astype(jnp.bfloat16)
    dc = up['conv']
    return apply_conv(dc['c2'], apply_conv(dc['c1'], x, relu=True), relu=True)


def make_deconv3x3_s2(pg, cin, cout):
    wt = pg.deconv_w(cin, cout, 3, 3)          # PyTorch layout (Cin, Cout, kh, kw)
    scale, shift = pg.bn(cout)
    coutp = _rup(cout, 128)

    def tapmat(taps):
        m = jnp.concatenate([wt[:, :, ky, kx] for ky, kx in taps], axis=0)
        m = jnp.pad(m, ((0, _rup(m.shape[0], 128) - m.shape[0]), (0, coutp - cout)))
        return m.astype(jnp.bfloat16)

    phase_ws = [tapmat([(1, 1)]),
                tapmat([(1, 0), (1, 2)]),
                tapmat([(0, 1), (2, 1)]),
                tapmat([(0, 0), (0, 2), (2, 0), (2, 2)])]
    return dict(phase_ws=phase_ws, s=_pad_nc(scale, coutp), b=_pad_nc(shift, coutp), cout=cout)


def make_deconv1x1(pg, cin, cout):
    wt = pg.deconv_w(cin, cout, 1, 1)
    scale, shift = pg.bn(cout)
    coutp = _rup(cout, 128)
    kp = _rup(cin, 128)
    wf = jnp.pad(wt[:, :, 0, 0], ((0, kp - cin), (0, coutp - cout))).astype(jnp.bfloat16)
    return dict(wf=wf, s=_pad_nc(scale, coutp), b=_pad_nc(shift, coutp), cout=cout)


def apply_deconv1x1(p, x, relu=True):
    n, h, w, c = x.shape
    out = matmul_affine(x.astype(jnp.bfloat16).reshape(n * h * w, c),
                        p['wf'], p['s'], p['b'], relu=relu)
    return out[:, :p['cout']].reshape(n, h, w, p['cout'])


def build_params():
    pg = ParamGen(jax.random.PRNGKey(0))
    P = {}
    P['conv1d'] = make_conv_params(pg, 3, 3, 1, 32)
    P['conv1rgb'] = make_conv_params(pg, 3, 3, 3, 32)
    # resnet34 layer1..layer4 (BasicBlock counts 3, 4, 6, 3)
    P['layer1'] = make_layer(pg, 64, 64, 3, 1)
    P['layer2'] = make_layer(pg, 64, 128, 4, 2)
    P['layer3'] = make_layer(pg, 128, 256, 6, 2)
    P['layer4'] = make_layer(pg, 256, 512, 3, 2)
    P['conv6'] = make_conv_params(pg, 3, 3, 512, 1024, stride=2, padding=1)
    P['dec1'] = make_deconv3x3_s2(pg, 1024, 512)
    P['dec2'] = make_up(pg, 512, 256)
    P['dec3'] = make_up(pg, 256, 128)
    P['dec4'] = make_up(pg, 128, 64)
    P['dec5'] = make_up(pg, 64, 32)
    P['dec6'] = make_deconv1x1(pg, 32, 1)
    return P


# ---------------------------------------------------------------------------
# model forward
# ---------------------------------------------------------------------------
def autoencoder_forward(params, rgb_nchw, d_nchw):
    rgb = jnp.transpose(rgb_nchw, (0, 2, 3, 1)).astype(jnp.bfloat16)
    d = jnp.transpose(d_nchw, (0, 2, 3, 1)).astype(jnp.bfloat16)

    depth_1 = apply_conv(params['conv1d'], d, relu=True)
    rgb_1 = apply_conv(params['conv1rgb'], rgb, relu=True)
    conv1 = jnp.concatenate([depth_1, rgb_1], axis=-1)          # 64 ch

    conv2 = apply_layer(params['layer1'], conv1)                # 64
    conv3 = apply_layer(params['layer2'], conv2)                # 128, /2
    conv4 = apply_layer(params['layer3'], conv3)                # 256, /4
    conv5 = apply_layer(params['layer4'], conv4)                # 512, /8
    conv6 = apply_conv(params['conv6'], conv5, relu=True)       # 1024, /16

    convt5 = deconv3x3_s2_subpixel(conv6, params['dec1']['phase_ws'],
                                   params['dec1']['s'], params['dec1']['b'],
                                   params['dec1']['cout'], relu=True)   # 512, /8
    y = apply_up(params['dec2'], convt5, conv5)                 # 256
    y = apply_up(params['dec3'], y, conv4)                      # 128
    y = apply_up(params['dec4'], y, conv3)                      # 64
    y = apply_up(params['dec5'], y, conv2)                      # 32
    y = apply_deconv1x1(params['dec6'], y, relu=True)           # 1
    return jnp.transpose(y.astype(jnp.float32), (0, 3, 1, 2))


# ---------------------------------------------------------------------------
if __name__ == "__main__":
    key = jax.random.PRNGKey(0)
    krgb, kd = jax.random.split(key)
    N, H, W = 2, 16, 16
    rgb = jax.random.normal(krgb, (N, 3, H, W), jnp.float32)
    depth = jax.random.normal(kd, (N, 1, H, W), jnp.float32)

    params = build_params()
    out = autoencoder_forward(params, rgb, depth)
    out = jax.block_until_ready(out)

    assert out.shape == (N, 1, H, W), out.shape
    assert bool(jnp.all(jnp.isfinite(out)))
    print("KERNEL_OK")
</pallas_src>

<mosaic_0001>
module attributes {stable_mosaic.version = 11 : i64} {
  func.func @_matmul_affine_kernel(%arg0: i32, %arg1: i32, %arg2: i32, %arg3: memref<256x128xbf16, #tpu.memory_space<vmem>>, %arg4: memref<128x128xbf16, #tpu.memory_space<vmem>>, %arg5: memref<1x128xf32, #tpu.memory_space<vmem>>, %arg6: memref<1x128xf32, #tpu.memory_space<vmem>>, %arg7: memref<256x128xbf16, #tpu.memory_space<vmem>>, %arg8: memref<256x128xf32, #tpu.memory_space<vmem>>) attributes {dimension_semantics = [#tpu.dimension_semantics<parallel>, #tpu.dimension_semantics<parallel>, #tpu.dimension_semantics<arbitrary>], iteration_bounds = array<i64: 2, 1, 1>, scalar_prefetch = 0 : i64, scratch_operands = 1 : i64, tpu.core_type = #tpu.core_type<tc>, window_params = [{transform_indices = @transform_0, window_bounds = array<i64: 256, 128>}, {transform_indices = @transform_1, window_bounds = array<i64: 128, 128>}, {transform_indices = @transform_2, window_bounds = array<i64: 1, 128>}, {transform_indices = @transform_3, window_bounds = array<i64: 1, 128>}, {transform_indices = @transform_4, window_bounds = array<i64: 256, 128>}]} {
    %c0_i32 = arith.constant 0 : i32
    %0 = arith.cmpi eq, %arg2, %c0_i32 : i32
    %1 = arith.extui %0 : i1 to i32
    %c0_i32_0 = arith.constant 0 : i32
    %2 = arith.cmpi ne, %1, %c0_i32_0 : i32
    scf.if %2 {
      %cst_10 = arith.constant 0.000000e+00 : f32
      %12 = vector.broadcast %cst_10 : f32 to vector<256x128xf32>
      %c0_11 = arith.constant 0 : index
      %c0_12 = arith.constant 0 : index
      %13 = vector.load %arg8[%c0_11, %c0_12] : memref<256x128xf32, #tpu.memory_space<vmem>>, vector<256x128xf32>
      tpu.vector_store %arg8[%c0_11, %c0_12], %12 {strides = array<i32>} : memref<256x128xf32, #tpu.memory_space<vmem>>, vector<256x128xf32>,
    } else {
    }
    %c0 = arith.constant 0 : index
    %c0_1 = arith.constant 0 : index
    %3 = vector.load %arg8[%c0, %c0_1] : memref<256x128xf32, #tpu.memory_space<vmem>>, vector<256x128xf32>
    %c0_2 = arith.constant 0 : index
    %c0_3 = arith.constant 0 : index
    %4 = vector.load %arg3[%c0_2, %c0_3] : memref<256x128xbf16, #tpu.memory_space<vmem>>, vector<256x128xbf16>
    %c0_4 = arith.constant 0 : index
    %c0_5 = arith.constant 0 : index
    %5 = vector.load %arg4[%c0_4, %c0_5] : memref<128x128xbf16, #tpu.memory_space<vmem>>, vector<128x128xbf16>
    %cst = arith.constant dense<0.000000e+00> : vector<256x128xf32>
    %6 = tpu.matmul %4, %5, %cst {dimension_numbers = #tpu.dot_dimension_numbers<[1], [0], [0], [1], [0, 0, 1, 1], [], []>} : vector<256x128xbf16>, vector<128x128xbf16>, vector<256x128xf32> -> vector<256x128xf32>
    %7 = arith.addf %3, %6 : vector<256x128xf32>
    %c0_6 = arith.constant 0 : index
    %c0_7 = arith.constant 0 : index
    %8 = vector.load %arg8[%c0_6, %c0_7] : memref<256x128xf32, #tpu.memory_space<vmem>>, vector<256x128xf32>
    tpu.vector_store %arg8[%c0_6, %c0_7], %7 {strides = array<i32>} : memref<256x128xf32, #tpu.memory_space<vmem>>, vector<256x128xf32>,
    %c0_i32_8 = arith.constant 0 : i32
    %9 = arith.cmpi eq, %arg2, %c0_i32_8 : i32
    %10 = arith.extui %9 : i1 to i32
    %c0_i32_9 = arith.constant 0 : i32
    %11 = arith.cmpi ne, %10, %c0_i32_9 : i32
    scf.if %11 {
      %c0_10 = arith.constant 0 : index
      %c0_11 = arith.constant 0 : index
      %12 = vector.load %arg8[%c0_10, %c0_11] : memref<256x128xf32, #tpu.memory_space<vmem>>, vector<256x128xf32>
      %c0_12 = arith.constant 0 : index
      %c0_13 = arith.constant 0 : index
      %13 = vector.load %arg5[%c0_12, %c0_13] : memref<1x128xf32, #tpu.memory_space<vmem>>, vector<1x128xf32>
      %14 = vector.broadcast %13 : vector<1x128xf32> to vector<256x128xf32>
      %15 = arith.mulf %12, %14 : vector<256x128xf32>
      %c0_14 = arith.constant 0 : index
      %c0_15 = arith.constant 0 : index
      %16 = vector.load %arg6[%c0_14, %c0_15] : memref<1x128xf32, #tpu.memory_space<vmem>>, vector<1x128xf32>
      %17 = vector.broadcast %16 : vector<1x128xf32> to vector<256x128xf32>
      %18 = arith.addf %15, %17 : vector<256x128xf32>
      %cst_16 = arith.constant 0.000000e+00 : f32
      %19 = vector.broadcast %cst_16 : f32 to vector<256x128xf32>
      %20 = arith.maximumf %18, %19 : vector<256x128xf32>
      %21 = arith.truncf %20 : vector<256x128xf32> to vector<256x128xbf16>
      %c0_17 = arith.constant 0 : index
      %c0_18 = arith.constant 0 : index
      %22 = vector.load %arg7[%c0_17, %c0_18] : memref<256x128xbf16, #tpu.memory_space<vmem>>, vector<256x128xbf16>
      tpu.vector_store %arg7[%c0_17, %c0_18], %21 {strides = array<i32>} : memref<256x128xbf16, #tpu.memory_space<vmem>>, vector<256x128xbf16>,
    } else {
    }
    return
  }
  func.func @transform_0(%arg0: i32, %arg1: i32, %arg2: i32) -> (i32, i32) {
    %c0_i32 = arith.constant 0 : i32
    return %arg0, %arg2 : i32, i32
  }
  func.func @transform_1(%arg0: i32, %arg1: i32, %arg2: i32) -> (i32, i32) {
    %c0_i32 = arith.constant 0 : i32
    return %arg2, %arg1 : i32, i32
  }
  func.func @transform_2(%arg0: i32, %arg1: i32, %arg2: i32) -> (i32, i32) {
    %c0_i32 = arith.constant 0 : i32
    %c0_i32_0 = arith.constant 0 : i32
    return %c0_i32, %arg1 : i32, i32
  }
  func.func @transform_3(%arg0: i32, %arg1: i32, %arg2: i32) -> (i32, i32) {
    %c0_i32 = arith.constant 0 : i32
    %c0_i32_0 = arith.constant 0 : i32
    return %c0_i32, %arg1 : i32, i32
  }
  func.func @transform_4(%arg0: i32, %arg1: i32, %arg2: i32) -> (i32, i32) {
    %c0_i32 = arith.constant 0 : i32
    return %arg0, %arg1 : i32, i32
  }
}

</mosaic_0001>

<bundles_post_ra>
// kernel: tpu_custom_call.1
= control target key start
LH: loop header
LB: loop body
LE: loop exit
PB: predicated region body
PF: predicated region fallthrough
CT: control target
= control target key end

     0   :  { %s1847_s0 = inlined_call_operand.hbm [shape: bf16[512,128], index: 0, kind: input, shape index: {}]   ;;  %s1848_s1 = inlined_call_operand.hbm [shape: bf16[128,128], index: 1, kind: input, shape index: {}]   ;;  %s1849_s2 = inlined_call_operand.vmem [shape: f32[1,128], index: 2, kind: input, shape index: {}]   ;;  %s1850_s3 = inlined_call_operand.vmem [shape: f32[1,128], index: 3, kind: input, shape index: {}]   ;;  %s1851_s4 = inlined_call_operand.hbm [shape: bf16[512,128], index: 4, kind: output, shape index: {}]  }
   0x1   :  { %1855 = sst [smem:[#allocation13_spill]] %s1848_s1 }
   0x2   :  { %9 = vsyncpa [#allocation4], 0 }
   0x3   :  { %11 = vsyncpa [#allocation4 + $0x1], 0 }
   0x4   :  { %12 = vsyncpa [#allocation7], 0 }
   0x5   :  { %13 = vsyncpa [#allocation5], 0 }
   0x6   :  { %15 = vsyncpa [#allocation5 + $0x1], 0  ;;  %s1577_s15 = smov 0   ;;  %s1579_s16 = smov 0  }
   0x7   :  { %s1581_s17 = smov 0   ;;  %s1583_s18 = smov 0  }
   0x8   :  { %s1585_s19 = smov 0   ;;  %s1587_s20 = smov 0  }
   0x9 LB: > { %s1060_s21 = sadd.s32 4294967295, %s1545_s20   ;;  %s1061_s22 = sadd.s32 4294967294, %s1545_s20   ;;  %s1545_s20 = sphi %s1587_s20, %s21_s20   ;;  %s1541_s19 = sphi %s1585_s19, %s1872_s19   ;;  %s1537_s18 = sphi %s1583_s18, %s1871_s18   ;;  %s1533_s17 = sphi %s1581_s17, %s1870_s17   ;;  %s1529_s16 = sphi %s1579_s16, %s1869_s16   ;;  %s1525_s15 = sphi %s1577_s15, %s1868_s15  }
   0xa   : > { %p62_p0 = scmp.ne.s32.totalorder %s1529_s16, %s1525_s15  ;;  %p1611_p1 = scmp.eq.s32.totalorder %s1060_s21, 0 }
   0xb   : > { %p1615_p2 = scmp.eq.s32.totalorder %s1060_s21, 1  ;;  %p174_p3 = scmp.eq.s32.totalorder %s1061_s22, 1 }
   0xc   : > { %p1621_p4 = por %p1611_p1, %p62_p0  ;;  %p1062_p5 = scmp.ge.s32.totalorder %s1545_s20, 1 }
   0xd   : > { %p1626_p6 = por %p174_p3, %p62_p0  ;;  %p181_p7 = scmp.lt.s32.totalorder %s1545_s20, 3 }
   0xe   : > { %s1860_s1 = sld [smem:[#allocation13_spill]]  ;;  %s1547_s5 = smov [#allocation6]  }
   0xf   : > { %p1634_p8 = pnand %p1062_p5, %p181_p7  ;;  %s198_s6 = sshll.u32 %s1547_s5, 4  ;;  %s199_s6 = int_to_ptr.vmem [resolvable:$true] %s198_s6 }
  0x10   : > { %p1066_p11 = scmp.ge.s32.totalorder %s1545_s20, 2  ;;  %s1852_s7 = smov 64  }
  0x11   : > { %p1328_p9 = pneg %p1634_p8  ;;  %s1853_s8 = smov 4  }
  0x12   : > { %s40_s9 = sadd.s32 1, %s1541_s19  ;;  %s49_s10 = sadd.s32 1, %s1533_s17 }
  0x13   : > { %p1329_p10 = pnand %p1328_p9, %p1611_p1  ;;  %p42_p12 = scmp.ge.s32.totalorder %s40_s9, 2 }
  0x14   : > { %s196_s29 = sshll.u32 %s1860_s1, 4  ;;  %p56_p13 = scmp.ne.s32.totalorder %s1533_s17, %s1529_s16  ;;  %s197_s29 = int_to_ptr.hbm [resolvable:$true] %s196_s29 }
  0x15   : > { %1331 = dma.hbm_to_vmem [thread:$0]  (!%p1329_p10), %s197_s29, 1024, %s199_s6, [#allocation7], %s1852_s7, %s1852_s7, %s1853_s8  }
  0x16   : > { %p57_p0 = scmp.eq.s32.totalorder %s1545_s20, 0  ;;  %s1874_s9 = smov (%p42_p12, %s40_s9), 0 }
  0x17   : > { %1862 = sst [smem:[#allocation12_spill]] %s1874_s9  ;;  %p1659_p5 = por %p1615_p2, %p56_p13 }
  0x18   : > { %p1653_p3 = por %p57_p0, %p56_p13  ;;  %s44_s13 = ssub.s32 %s1541_s19, %s1874_s9 }
  0x19   : > { %p1341_p7 = scmp.lt.s32.totalorder %s1545_s20, 2  ;;  %p47_p9 = scmp.eq.s32.totalorder %s44_s13, 0 }
  0x1a   : > { %s224_s14 = sand.u32 1, %s1533_s17   ;;  %s1175_s27 = sshll.u32 %s1541_s19, 7 }
  0x1b   : > { %s1067_s21 = sshll.u32 %s224_s14, 7  ;;  %s234_s5 = scalar_lea.hbm %s1847_s0, %s1175_s27 }
  0x1c   : > { %s1668_s22 = scalar_select %p47_p9, %s1533_s17, %s49_s10  }
  0x1d   : > { %s228_s6 = scalar_lea.vmem [#allocation3], %s1067_s21  ;;  %s235_s24 = sshll.u32 %s234_s5, 4  ;;  %s236_s24 = int_to_ptr.hbm [resolvable:$true] %s235_s24 }
  0x1e   : > { %s237_s7 = sshll.u32 %s228_s6, 4  ;;  %p1333_p2 = pnand %p1341_p7, %p1653_p3  ;;  %s238_s7 = int_to_ptr.vmem [resolvable:$true] %s237_s7 }
  0x1f   : > { %s225_s8 = scalar_lea.sflag [#allocation4], %s224_s14  ;;  %s1865_s1 = smov 4  }
  0x20   : > { %s1866_s9 = smov 64   ;;  %249 = sbr.rel (%p1634_p8) target bundleno = 274 (0x112), region = 36 }
  0x21   : > { %1335 = dma.hbm_to_vmem [thread:$0]  (!%p1333_p2), %s236_s24, 2048, %s238_s7, %s225_s8, %s1866_s9, %s1866_s9, %s1865_s1  }
  0x22   : > { %s1682_s10 = sand.u32 (!%p1634_p8), 1, %s1529_s16  }
  0x23   : > { %s1071_s13 = sshll.u32 (!%p1634_p8), %s1682_s10, 7  ;;  %s252_s21 = scalar_lea.sflag (!%p1634_p8), [#allocation4], %s1682_s10 }
  0x24   : > { %s1688_s11 = scalar_lea.vmem (!%p1634_p8), [#allocation3], %s1071_s13 }
  0x25   : > { %1512 = dma.done.wait (%p1621_p4), %s252_s21, 2048  }
  0x26   : > { %1514 = vsyncadd (%p1621_p4), %s252_s21, 4294965248 }
  0x27   : > { %1516 = dma.done.wait (%p1611_p1), [#allocation7], 1024  }
  0x28   : > { %1518 = vsyncadd (%p1611_p1), [#allocation7], 4294966272  ;;  %v1199_v0 = vld [vmem:[#allocation6 + $0x38] sm:$0xff]  ;;  %v1198_v1 = vld [vmem:[#allocation6 + $0x30] sm:$0xff]  ;;  %s1740_s7 = scalar_lea.vmem [#allocation8], %s1071_s13  ;;  %s1200_s8 = sshll.u32 %s1537_s18, 7 }
  0x29   : > { %561 = vmatpush.bf16.msra.mxu0 %v1199_v0  ;;  %1296 = vmatpush.bf16.msra.mxu1 %v1199_v0  ;;  %v1197_v2 = vld [vmem:[#allocation6 + $0x28] sm:$0xff]  ;;  %v1196_v3 = vld [vmem:[#allocation6 + $0x20] sm:$0xff]  ;;  %v1195_v4 = vld [vmem:[#allocation6 + $0x18] sm:$0xff]  ;;  %s930_s27 = scalar_lea.hbm %s1851_s4, %s1200_s8  ;;  %s931_s18 = sshll.u32 %s1740_s7, 4  ;;  %s932_s18 = int_to_ptr.vmem [resolvable:$true] %s931_s18 }
  0x2a   : > { %1297 = vmatpush.bf16.msra.mxu2 %v1199_v0  ;;  %1298 = vmatpush.bf16.msra.mxu3 %v1199_v0  ;;  %v1194_v5 = vld [vmem:[#allocation6 + $0x10] sm:$0xff]  ;;  %v1193_v6 = vld [vmem:[#allocation6 + $0x8] sm:$0xff]  ;;  %v1192_v7 = vld [vmem:[#allocation6] sm:$0xff]  ;;  %s933_s28 = sshll.u32 %s930_s27, 4  ;;  %s918_s29 = scalar_lea.sflag [#allocation5], %s1682_s10  ;;  %s934_s28 = int_to_ptr.hbm [resolvable:$true] %s933_s28 }
  0x2b   : > { %v1176_v8 = vld [vmem:[%s1688_s11] sm:$0xff]  ;;  %v1177_v12 = vld [vmem:[%s1688_s11 + $0x8] sm:$0xff]  ;;  %v1178_v16 = vld [vmem:[%s1688_s11 + $0x10] sm:$0xff]  ;;  %s1473_s5 = sshra.s32 %s934_s28, 4  ;;  %s1479_s21 = scalar_lea.hbm %s1851_s4, 256  ;;  %s1474_s5 = int_to_ptr.hbm [resolvable:$true] %s1473_s5 }
  0x2c   : > { %v1180_v9 = vld [vmem:[%s1688_s11 + $0x20] sm:$0xff]  ;;  %v1181_v13 = vld [vmem:[%s1688_s11 + $0x28] sm:$0xff]  ;;  %v1182_v17 = vld [vmem:[%s1688_s11 + $0x30] sm:$0xff]  ;;  %s1475_s6 = scalar_lea.hbm %s1474_s5, 128  ;;  %p1480_p10 = scmp.lt.s32.totalorder %s1474_s5, %s1851_s4 }
  0x2d   : > { %562 = vmatpush.bf16.msra.mxu0 %v1198_v1  ;;  %1299 = vmatpush.bf16.msra.mxu1 %v1198_v1  ;;  %v1184_v10 = vld [vmem:[%s1688_s11 + $0x40] sm:$0xff]  ;;  %v1185_v14 = vld [vmem:[%s1688_s11 + $0x48] sm:$0xff]  ;;  %v1186_v18 = vld [vmem:[%s1688_s11 + $0x50] sm:$0xff]  ;;  %p1476_p1 = scmp.ne.s32.totalorder %s1474_s5, %s1475_s6  ;;  %p1481_p12 = scmp.lt.s32.totalorder %s1479_s21, %s1475_s6 }
  0x2e   : > { %1300 = vmatpush.bf16.msra.mxu2 %v1198_v1  ;;  %1301 = vmatpush.bf16.msra.mxu3 %v1198_v1  ;;  %v1188_v11 = vld [vmem:[%s1688_s11 + $0x60] sm:$0xff]  ;;  %v1189_v15 = vld [vmem:[%s1688_s11 + $0x68] sm:$0xff]  ;;  %v1190_v19 = vld [vmem:[%s1688_s11 + $0x70] sm:$0xff] }
  0x2f   : > { %v1179_v20 = vld [vmem:[%s1688_s11 + $0x18] sm:$0xff]  ;;  %v1717_v26 = vld [vmem:[%s1849_s2] ss:$0 sm:$0xff]  ;;  %p1477_p4 = pnand %p1476_p1, %p1659_p5  ;;  %p1482_p13 = por %p1481_p12, %p1480_p10 }
  0x30   : > { %v1183_v21 = vld [vmem:[%s1688_s11 + $0x38] sm:$0xff]  ;;  %v1723_v28 = vld [vmem:[%s1850_s3] ss:$0 sm:$0xff] }
  0x31   : > { %563 = vmatpush.bf16.msra.mxu0 %v1197_v2  ;;  %1302 = vmatpush.bf16.msra.mxu1 %v1197_v2  ;;  %v1187_v22 = vld [vmem:[%s1688_s11 + $0x58] sm:$0xff]  ;;  %p1478_p8 = pneg %p1477_p4 }
  0x32   : > { %1303 = vmatpush.bf16.msra.mxu2 %v1197_v2  ;;  %1304 = vmatpush.bf16.msra.mxu3 %v1197_v2  ;;  %v1191_v23 = vld [vmem:[%s1688_s11 + $0x78] sm:$0xff] }
  0x33   : > { %p1483_p0 = pnand %p1482_p13, %p1478_p8 }
  0x35   : > { %564 = vmatpush.bf16.msra.mxu0 %v1196_v3  ;;  %1305 = vmatpush.bf16.msra.mxu1 %v1196_v3 }
  0x36   : > { %1306 = vmatpush.bf16.msra.mxu2 %v1196_v3  ;;  %1307 = vmatpush.bf16.msra.mxu3 %v1196_v3 }
  0x39   : > { %565 = vmatpush.bf16.msra.mxu0 %v1195_v4  ;;  %1308 = vmatpush.bf16.msra.mxu1 %v1195_v4 }
  0x3a   : > { %1309 = vmatpush.bf16.msra.mxu2 %v1195_v4  ;;  %1310 = vmatpush.bf16.msra.mxu3 %v1195_v4 }
  0x3d   : > { %566 = vmatpush.bf16.msra.mxu0 %v1194_v5  ;;  %1311 = vmatpush.bf16.msra.mxu1 %v1194_v5 }
  0x3e   : > { %1312 = vmatpush.bf16.msra.mxu2 %v1194_v5  ;;  %1313 = vmatpush.bf16.msra.mxu3 %v1194_v5 }
  0x41   : > { %567 = vmatpush.bf16.msra.mxu0 %v1193_v6  ;;  %1314 = vmatpush.bf16.msra.mxu1 %v1193_v6 }
  0x42   : > { %1315 = vmatpush.bf16.msra.mxu2 %v1193_v6  ;;  %1316 = vmatpush.bf16.msra.mxu3 %v1193_v6 }
  0x45   : > { %568 = vmatpush.bf16.msra.mxu0 %v1192_v7  ;;  %1317 = vmatpush.bf16.msra.mxu1 %v1192_v7 }
  0x46   : > { %1318 = vmatpush.bf16.msra.mxu2 %v1192_v7  ;;  %1319 = vmatpush.bf16.msra.mxu3 %v1192_v7 }
  0x48   : > { %569 = vmatmul.bf16.vlgmr.msra.gmra.mxu0 %v1176_v8  ;;  %589 = vmatmul.bf16.vlgmr.msra.gmra.mxu1 %v1180_v9 }
  0x49   : > { %609 = vmatmul.bf16.vlgmr.msra.gmra.mxu2 %v1184_v10  ;;  %629 = vmatmul.bf16.vlgmr.msra.gmra.mxu3 %v1188_v11 }
  0x58   : > { %574 = vmatmul.bf16.gmra.mxu0 %v1177_v12  ;;  %594 = vmatmul.bf16.gmra.mxu1 %v1181_v13 }
  0x59   : > { %614 = vmatmul.bf16.gmra.mxu2 %v1185_v14  ;;  %634 = vmatmul.bf16.gmra.mxu3 %v1189_v15 }
  0x68   : > { %579 = vmatmul.bf16.gmra.mxu0 %v1178_v16  ;;  %599 = vmatmul.bf16.gmra.mxu1 %v1182_v17 }
  0x69   : > { %619 = vmatmul.bf16.gmra.mxu2 %v1186_v18  ;;  %639 = vmatmul.bf16.gmra.mxu3 %v1190_v19 }
  0x78   : > { %584 = vmatmul.bf16.gmra.mxu0 %v1179_v20  ;;  %604 = vmatmul.bf16.gmra.mxu1 %v1183_v21 }
  0x79   : > { %624 = vmatmul.bf16.gmra.mxu2 %v1187_v22  ;;  %644 = vmatmul.bf16.gmra.mxu3 %v1191_v23 }
  0xc5   : > { %v570_v24 = vpop.f32.mrf.mxu0  ;;  %v590_v25 = vpop.f32.mrf.mxu1 }
  0xc6   : > { %v753_v27 = vmul.f32 %v1717_v26, %v570_v24  ;;  %v761_v29 = vmul.f32 %v1717_v26, %v590_v25 }
  0xc8   : > { %v789_v34 = vadd.f32 %v1723_v28, %v753_v27  ;;  %v797_v35 = vadd.f32 %v1723_v28, %v761_v29 }
  0xca   : > { %v821_v42 = vmax.f32 %v789_v34, 0.0  ;;  %v829_v43 = vmax.f32 %v797_v35, 0.0 }
  0xcc   : > { %v610_v30 = vpop.f32.mrf.mxu2  ;;  %v630_v31 = vpop.f32.mrf.mxu3 }
  0xcd   : > { %v572_v32 = vpop.f32.mrf.mxu0  ;;  %v592_v33 = vpop.f32.mrf.mxu1  ;;  %v769_v40 = vmul.f32 %v1717_v26, %v610_v30  ;;  %v777_v41 = vmul.f32 %v1717_v26, %v630_v31 }
  0xce   : > { %v754_v36 = vmul.f32 %v1717_v26, %v572_v32  ;;  %v762_v37 = vmul.f32 %v1717_v26, %v592_v33 }
  0xcf   : > { %v805_v50 = vadd.f32 %v1723_v28, %v769_v40  ;;  %v813_v51 = vadd.f32 %v1723_v28, %v777_v41 }
  0xd0   : > { %v790_v38 = vadd.f32 %v1723_v28, %v754_v36  ;;  %v798_v39 = vadd.f32 %v1723_v28, %v762_v37 }
  0xd1   : > { %v837_v58 = vmax.f32 %v805_v50, 0.0  ;;  %v845_v59 = vmax.f32 %v813_v51, 0.0 }
  0xd2   : > { %v822_v44 = vmax.f32 %v790_v38, 0.0  ;;  %v830_v45 = vmax.f32 %v798_v39, 0.0 }
  0xd4   : > { %v1204_v46 = vpack.c.bf16 %v822_v44, %v821_v42  ;;  %v1224_v47 = vpack.c.bf16 %v830_v45, %v829_v43  ;;  %v612_v48 = vpop.f32.mrf.mxu2  ;;  %v632_v49 = vpop.f32.mrf.mxu3 }
  0xd5   : > { %v770_v52 = vmul.f32 %v1717_v26, %v612_v48  ;;  %v778_v53 = vmul.f32 %v1717_v26, %v632_v49  ;;  %v575_v54 = vpop.f32.mrf.mxu0  ;;  %v595_v55 = vpop.f32.mrf.mxu1 }
  0xd6   : > { %1205 = vst [vmem:[%s1740_s7] sm:$0xff] %v1204_v46   ;;  %v755_v62 = vmul.f32 %v1717_v26, %v575_v54  ;;  %v763_v63 = vmul.f32 %v1717_v26, %v595_v55 }
  0xd7   : > { %1284 = vst [vmem:[%s1740_s7 + $0x20] sm:$0xff] %v1224_v47   ;;  %v806_v56 = vadd.f32 %v1723_v28, %v770_v52  ;;  %v814_v57 = vadd.f32 %v1723_v28, %v778_v53 }
  0xd8   : > { %v791_v6 = vadd.f32 %v1723_v28, %v755_v62  ;;  %v799_v7 = vadd.f32 %v1723_v28, %v763_v63 }
  0xd9   : > { %v838_v60 = vmax.f32 %v806_v56, 0.0  ;;  %v846_v61 = vmax.f32 %v814_v57, 0.0 }
  0xda   : > { %v823_v14 = vmax.f32 %v791_v6, 0.0  ;;  %v831_v15 = vmax.f32 %v799_v7, 0.0 }
  0xdb   : > { %v1244_v0 = vpack.c.bf16 %v838_v60, %v837_v58  ;;  %v1264_v1 = vpack.c.bf16 %v846_v61, %v845_v59 }
  0xdc   : > { %v615_v2 = vpop.f32.mrf.mxu2  ;;  %v635_v3 = vpop.f32.mrf.mxu3 }
  0xdd   : > { %1288 = vst [vmem:[%s1740_s7 + $0x40] sm:$0xff] %v1244_v0   ;;  %v577_v4 = vpop.f32.mrf.mxu0  ;;  %v597_v5 = vpop.f32.mrf.mxu1  ;;  %v771_v12 = vmul.f32 %v1717_v26, %v615_v2  ;;  %v779_v13 = vmul.f32 %v1717_v26, %v635_v3 }
  0xde   : > { %1292 = vst [vmem:[%s1740_s7 + $0x60] sm:$0xff] %v1264_v1   ;;  %v756_v8 = vmul.f32 %v1717_v26, %v577_v4  ;;  %v764_v9 = vmul.f32 %v1717_v26, %v597_v5 }
  0xdf   : > { %v807_v22 = vadd.f32 %v1723_v28, %v771_v12  ;;  %v815_v23 = vadd.f32 %v1723_v28, %v779_v13 }
  0xe0   : > { %v792_v10 = vadd.f32 %v1723_v28, %v756_v8  ;;  %v800_v11 = vadd.f32 %v1723_v28, %v764_v9 }
  0xe1   : > { %v839_v32 = vmax.f32 %v807_v22, 0.0  ;;  %v847_v33 = vmax.f32 %v815_v23, 0.0 }
  0xe2   : > { %v824_v16 = vmax.f32 %v792_v10, 0.0  ;;  %v832_v17 = vmax.f32 %v800_v11, 0.0 }
  0xe4   : > { %v1209_v18 = vpack.c.bf16 %v824_v16, %v823_v14  ;;  %v1229_v19 = vpack.c.bf16 %v832_v17, %v831_v15  ;;  %v617_v20 = vpop.f32.mrf.mxu2  ;;  %v637_v21 = vpop.f32.mrf.mxu3 }
  0xe5   : > { %v772_v24 = vmul.f32 %v1717_v26, %v617_v20  ;;  %v780_v25 = vmul.f32 %v1717_v26, %v637_v21  ;;  %v580_v27 = vpop.f32.mrf.mxu0  ;;  %v600_v29 = vpop.f32.mrf.mxu1 }
  0xe6   : > { %1281 = vst [vmem:[%s1740_s7 + $0x8] sm:$0xff] %v1209_v18   ;;  %v757_v36 = vmul.f32 %v1717_v26, %v580_v27  ;;  %v765_v37 = vmul.f32 %v1717_v26, %v600_v29 }
  0xe7   : > { %1285 = vst [vmem:[%s1740_s7 + $0x28] sm:$0xff] %v1229_v19   ;;  %v808_v30 = vadd.f32 %v1723_v28, %v772_v24  ;;  %v816_v31 = vadd.f32 %v1723_v28, %v780_v25 }
  0xe8   : > { %v793_v44 = vadd.f32 %v1723_v28, %v757_v36  ;;  %v801_v45 = vadd.f32 %v1723_v28, %v765_v37 }
  0xe9   : > { %v840_v34 = vmax.f32 %v808_v30, 0.0  ;;  %v848_v35 = vmax.f32 %v816_v31, 0.0 }
  0xea   : > { %v825_v52 = vmax.f32 %v793_v44, 0.0  ;;  %v833_v53 = vmax.f32 %v801_v45, 0.0 }
  0xeb   : > { %v1249_v38 = vpack.c.bf16 %v840_v34, %v839_v32  ;;  %v1269_v39 = vpack.c.bf16 %v848_v35, %v847_v33 }
  0xec   : > { %v620_v40 = vpop.f32.mrf.mxu2  ;;  %v640_v41 = vpop.f32.mrf.mxu3 }
  0xed   : > { %1289 = vst [vmem:[%s1740_s7 + $0x48] sm:$0xff] %v1249_v38   ;;  %v582_v42 = vpop.f32.mrf.mxu0  ;;  %v602_v43 = vpop.f32.mrf.mxu1  ;;  %v773_v50 = vmul.f32 %v1717_v26, %v620_v40  ;;  %v781_v51 = vmul.f32 %v1717_v26, %v640_v41 }
  0xee   : > { %1293 = vst [vmem:[%s1740_s7 + $0x68] sm:$0xff] %v1269_v39   ;;  %v758_v46 = vmul.f32 %v1717_v26, %v582_v42  ;;  %v766_v47 = vmul.f32 %v1717_v26, %v602_v43 }
  0xef   : > { %v809_v60 = vadd.f32 %v1723_v28, %v773_v50  ;;  %v817_v61 = vadd.f32 %v1723_v28, %v781_v51 }
  0xf0   : > { %v794_v48 = vadd.f32 %v1723_v28, %v758_v46  ;;  %v802_v49 = vadd.f32 %v1723_v28, %v766_v47 }
  0xf1   : > { %v841_v4 = vmax.f32 %v809_v60, 0.0  ;;  %v849_v5 = vmax.f32 %v817_v61, 0.0 }
  0xf2   : > { %v826_v54 = vmax.f32 %v794_v48, 0.0  ;;  %v834_v55 = vmax.f32 %v802_v49, 0.0 }
  0xf4   : > { %v1214_v56 = vpack.c.bf16 %v826_v54, %v825_v52  ;;  %v1234_v57 = vpack.c.bf16 %v834_v55, %v833_v53  ;;  %v622_v58 = vpop.f32.mrf.mxu2  ;;  %v642_v59 = vpop.f32.mrf.mxu3 }
  0xf5   : > { %v774_v62 = vmul.f32 %v1717_v26, %v622_v58  ;;  %v782_v63 = vmul.f32 %v1717_v26, %v642_v59  ;;  %v585_v0 = vpop.f32.mrf.mxu0  ;;  %v605_v1 = vpop.f32.mrf.mxu1 }
  0xf6   : > { %1282 = vst [vmem:[%s1740_s7 + $0x10] sm:$0xff] %v1214_v56   ;;  %v759_v8 = vmul.f32 %v1717_v26, %v585_v0  ;;  %v767_v9 = vmul.f32 %v1717_v26, %v605_v1 }
  0xf7   : > { %1286 = vst [vmem:[%s1740_s7 + $0x30] sm:$0xff] %v1234_v57   ;;  %v810_v2 = vadd.f32 %v1723_v28, %v774_v62  ;;  %v818_v3 = vadd.f32 %v1723_v28, %v782_v63 }
  0xf8   : > { %v795_v16 = vadd.f32 %v1723_v28, %v759_v8  ;;  %v803_v17 = vadd.f32 %v1723_v28, %v767_v9 }
  0xf9   : > { %v842_v6 = vmax.f32 %v810_v2, 0.0  ;;  %v850_v7 = vmax.f32 %v818_v3, 0.0 }
  0xfa   : > { %v827_v24 = vmax.f32 %v795_v16, 0.0  ;;  %v835_v25 = vmax.f32 %v803_v17, 0.0 }
  0xfb   : > { %v1254_v10 = vpack.c.bf16 %v842_v6, %v841_v4  ;;  %v1274_v11 = vpack.c.bf16 %v850_v7, %v849_v5 }
  0xfc   : > { %v625_v12 = vpop.f32.mrf.mxu2  ;;  %v645_v13 = vpop.f32.mrf.mxu3 }
  0xfd   : > { %1290 = vst [vmem:[%s1740_s7 + $0x50] sm:$0xff] %v1254_v10   ;;  %v587_v14 = vpop.f32.mrf.mxu0  ;;  %v607_v15 = vpop.f32.mrf.mxu1  ;;  %v775_v22 = vmul.f32 %v1717_v26, %v625_v12  ;;  %v783_v23 = vmul.f32 %v1717_v26, %v645_v13 }
  0xfe   : > { %1294 = vst [vmem:[%s1740_s7 + $0x70] sm:$0xff] %v1274_v11   ;;  %v760_v18 = vmul.f32 %v1717_v26, %v587_v14  ;;  %v768_v19 = vmul.f32 %v1717_v26, %v607_v15 }
  0xff   : > { %v811_v34 = vadd.f32 %v1723_v28, %v775_v22  ;;  %v819_v35 = vadd.f32 %v1723_v28, %v783_v23 }
 0x100   : > { %v796_v20 = vadd.f32 %v1723_v28, %v760_v18  ;;  %v804_v21 = vadd.f32 %v1723_v28, %v768_v19 }
 0x101   : > { %v843_v40 = vmax.f32 %v811_v34, 0.0  ;;  %v851_v41 = vmax.f32 %v819_v35, 0.0 }
 0x102   : > { %v828_v27 = vmax.f32 %v796_v20, 0.0  ;;  %v836_v29 = vmax.f32 %v804_v21, 0.0 }
 0x104   : > { %v1219_v30 = vpack.c.bf16 %v828_v27, %v827_v24  ;;  %v1239_v31 = vpack.c.bf16 %v836_v29, %v835_v25  ;;  %v627_v32 = vpop.f32.mrf.mxu2  ;;  %v647_v33 = vpop.f32.mrf.mxu3 }
 0x105   : > { %v776_v36 = vmul.f32 %v1717_v26, %v627_v32  ;;  %v784_v37 = vmul.f32 %v1717_v26, %v647_v33 }
 0x106   : > { %1283 = vst [vmem:[%s1740_s7 + $0x18] sm:$0xff] %v1219_v30  }
 0x107   : > { %1287 = vst [vmem:[%s1740_s7 + $0x38] sm:$0xff] %v1239_v31   ;;  %v812_v38 = vadd.f32 %v1723_v28, %v776_v36  ;;  %v820_v39 = vadd.f32 %v1723_v28, %v784_v37 }
 0x109   : > { %v844_v42 = vmax.f32 %v812_v38, 0.0  ;;  %v852_v26 = vmax.f32 %v820_v39, 0.0 }
 0x10b   : > { %v1259_v43 = vpack.c.bf16 %v844_v42, %v843_v40  ;;  %v1279_v44 = vpack.c.bf16 %v852_v26, %v851_v41 }
 0x10d   : > { %1291 = vst [vmem:[%s1740_s7 + $0x58] sm:$0xff] %v1259_v43  }
 0x10e   : > { %1295 = vst [vmem:[%s1740_s7 + $0x78] sm:$0xff] %v1279_v44  }
 0x10f   : > { %1486 = shalt.err (!%p1483_p0)
}
 0x110   : > { %s1550_s10 = smov 64   ;;  %s1551_s23 = smov 4  }
 0x111   : > { %1326 = dma.vmem_to_hbm [thread:$0]  (%p1659_p5), %s932_s18, 2048, %s934_s28, %s918_s29, %s1550_s10, %s1550_s10, %s1551_s23  }
 0x112 PF: > { %s948_s25 = sand.u32 1, %s1525_s15   ;;  %p1337_p3 = pnand %p1066_p11, %p1626_p6 }
 0x113   : > { %s949_s30 = scalar_lea.sflag [#allocation5], %s948_s25 }
 0x114   : > { %p1338_p7 = pneg %p1337_p3 }
 0x116   : > { %1520 = dma.done.wait (%p1338_p7), %s949_s30, 2048  }
 0x117   : > { %1522 = vsyncadd (%p1338_p7), %s949_s30, 4294965248  ;;  %s21_s20 = sadd.s32 1, %s1545_s20   ;;  %s1867_s12 = sld [smem:[#allocation12_spill]] }
 0x118   : > { %p18_p9 = scmp.ge.s32.totalorder %s21_s20, 4   ;;  %s1868_s15 = smov %s1529_s16 }
 0x119   : > { %s1869_s16 = smov %s1533_s17  ;;  %s1870_s17 = smov %s1668_s22 }
 0x11a   : > { %s1871_s18 = smov %s1541_s19  ;;  %20 = sbr.rel (!%p18_p9) target bundleno = 9 (0x9), region = 100 }
 0x11d   : > { %s1872_s19 = smov %s1867_s12 }
 0x11f   :  { %955 = vsyncpa [#allocation4], 1 }
 0x120   :  { %957 = vsyncpa [#allocation4 + $0x1], 1 }
 0x121   :  { %958 = vsyncpa [#allocation7], 1 }
 0x122   :  { %959 = vsyncpa [#allocation5], 1 }
 0x123   :  { %961 = vsyncpa [#allocation5 + $0x1], 1 }

</bundles_post_ra>
